<compile_context>
chip_gen: v7x
topology: tpu7x:2x2x1
jax: 0.10.0
libtpu: 0.0.40
codegen_flags: <defaults>
</compile_context>

<pallas_src>
import functools

import jax
import jax.numpy as jnp
from jax.experimental import pallas as pl
from jax.experimental.pallas import tpu as pltpu

_NEG_SLOPE = 0.2
_SUBLANE = 16          # bf16 sublane granule for the batch tile
_TM_MAX = 512          # max batch-tile rows (amortizes ~0.35us/step grid overhead)


def _round_up(x, m):
    return (x + m - 1) // m * m


def _tpu_kind():
    try:
        return jax.devices()[0].device_kind.lower()
    except Exception:
        return ""


def _act_dtype(kind):
    # v5-class chips have no bf16 VPU path -> keep LeakyReLU/bias math in f32 there.
    return jnp.float32 if "v5" in kind else jnp.bfloat16


def _mlp_kernel(x_ref, w1_ref, b1_ref, w2_ref, b2_ref, w3_ref, b3_ref, o_ref,
                *, act_dtype):
    # Layer 1: Linear(2L, 512) + LeakyReLU(0.2). bf16 operands, f32 MXU accumulation.
    h1 = jnp.dot(x_ref[...], w1_ref[...],
                 preferred_element_type=jnp.float32) + b1_ref[...]
    h1 = h1.astype(act_dtype)
    h1 = jnp.where(h1 > 0, h1, _NEG_SLOPE * h1)

    # Layer 2: Linear(512, 256) + LeakyReLU(0.2)
    h2 = jnp.dot(h1.astype(jnp.bfloat16), w2_ref[...],
                 preferred_element_type=jnp.float32) + b2_ref[...]
    h2 = h2.astype(act_dtype)
    h2 = jnp.where(h2 > 0, h2, _NEG_SLOPE * h2)

    # Output layer: Linear(256, L), stored unpadded in f32.
    out = jnp.dot(h2.astype(jnp.bfloat16), w3_ref[...],
                  preferred_element_type=jnp.float32) + b3_ref[...]
    o_ref[...] = out.astype(o_ref.dtype)


def transformer_forward(latent, noise, params):
    """latent, noise: (B, L) float32. Returns (B, L) float32."""
    w1, b1, w2, b2, w3, b3 = params
    B, L = latent.shape
    kind = _tpu_kind()
    act_dtype = _act_dtype(kind)

    # Concat fused in the wrapper and cast to bf16 (halves input DMA bytes, keeps
    # layer 1 as one K=2L matmul feeding the MXU).
    x = jnp.concatenate([latent, noise], axis=1).astype(jnp.bfloat16)   # (B, 2L)

    # Batch tiling: bound zero-row padding to < one bf16 sublane granule.
    n_tiles = pl.cdiv(B, _TM_MAX)
    if "v7" in kind and B >= 256:
        n_tiles = max(n_tiles, 2)          # keep both v7x TensorCores busy
        n_tiles += n_tiles % 2             # even split across the 2 TCs
    TM = _round_up(pl.cdiv(B, n_tiles), _SUBLANE)
    Bp = _round_up(B, TM)
    if Bp != B:
        x = jnp.pad(x, ((0, Bp - B), (0, 0)))
    grid_m = Bp // TM

    if "v7" in kind and grid_m >= 2:
        dim_sem = (pltpu.CORE_PARALLEL,)   # actually shard batch across the 2 TCs
    else:
        dim_sem = ("parallel",)

    def full_spec(arr):
        return pl.BlockSpec(arr.shape, lambda i: (0, 0))

    out = pl.pallas_call(
        functools.partial(_mlp_kernel, act_dtype=act_dtype),
        out_shape=jax.ShapeDtypeStruct((Bp, L), jnp.float32),
        grid=(grid_m,),
        in_specs=[
            pl.BlockSpec((TM, 2 * L), lambda i: (i, 0)),   # concat(latent, noise) tile
            full_spec(w1), full_spec(b1),
            full_spec(w2), full_spec(b2),
            full_spec(w3), full_spec(b3),
        ],
        out_specs=pl.BlockSpec((TM, L), lambda i: (i, 0)),
        compiler_params=pltpu.CompilerParams(dimension_semantics=dim_sem),
    )(x, w1, b1, w2, b2, w3, b3)
    return out if Bp == B else out[:B]


def init_params(key, latent_dim):
    """Deterministic init matching the PyTorch module's parameter shapes.

    PyTorch nn.Linear(in, out) stores weight as (out, in); we store the transpose
    (in, out) so the kernel computes x @ W + b.
    """
    dims = [(latent_dim * 2, 512), (512, 256), (256, latent_dim)]
    params = []
    for fan_in, fan_out in dims:
        key, kw, kb = jax.random.split(key, 3)
        bound = 1.0 / (fan_in ** 0.5)
        w = jax.random.uniform(kw, (fan_in, fan_out), jnp.float32, -bound, bound)
        b = jax.random.uniform(kb, (1, fan_out), jnp.float32, -bound, bound)
        params += [w, b]
    return tuple(params)  # (w1, b1, w2, b2, w3, b3)


def prepare_params(raw_params):
    """One-time param prep: weights to bf16 (halves weight DMA), biases stay f32
    (added to the f32 MXU accumulator)."""
    w1, b1, w2, b2, w3, b3 = raw_params
    return (w1.astype(jnp.bfloat16), b1,
            w2.astype(jnp.bfloat16), b2,
            w3.astype(jnp.bfloat16), b3)


if __name__ == "__main__":
    LATENT = 32
    BATCH = 8

    key = jax.random.PRNGKey(0)
    k_params, k_latent, k_noise = jax.random.split(key, 3)

    raw = init_params(k_params, LATENT)
    params = prepare_params(raw)

    latent = jax.random.normal(k_latent, (BATCH, LATENT), jnp.float32)
    # TODO(synk): the PyTorch forward draws np.random.normal(0,1, latent.size())
    # internally; here the same-shaped standard normal is a deterministic external
    # input (could alternatively be generated in-kernel with pltpu.prng_*).
    noise = jax.random.normal(k_noise, (BATCH, LATENT), jnp.float32)

    out = jax.block_until_ready(transformer_forward(latent, noise, params))

    # Pure-JAX reference mirroring the kernel's dtype path exactly
    # (bf16 operands, f32 accumulation, activation dtype per chip).
    act_dtype = _act_dtype(_tpu_kind())
    w1, b1, w2, b2, w3, b3 = params
    x = jnp.concatenate([latent, noise], axis=1).astype(jnp.bfloat16)
    h1 = jnp.dot(x, w1, preferred_element_type=jnp.float32) + b1
    h1 = h1.astype(act_dtype)
    h1 = jnp.where(h1 > 0, h1, _NEG_SLOPE * h1)
    h2 = jnp.dot(h1.astype(jnp.bfloat16), w2, preferred_element_type=jnp.float32) + b2
    h2 = h2.astype(act_dtype)
    h2 = jnp.where(h2 > 0, h2, _NEG_SLOPE * h2)
    ref = (jnp.dot(h2.astype(jnp.bfloat16), w3, preferred_element_type=jnp.float32)
           + b3).astype(jnp.float32)

    assert out.shape == (BATCH, LATENT)
    max_err = float(jnp.max(jnp.abs(out - ref)))
    assert jnp.allclose(out, ref, atol=2e-2, rtol=2e-2), max_err

    print("KERNEL_OK")
</pallas_src>

<mosaic_0001>
module attributes {stable_mosaic.version = 11 : i64} {
  func.func @_mlp_kernel(%arg0: i32, %arg1: memref<16x64xbf16, #tpu.memory_space<vmem>>, %arg2: memref<64x512xbf16, #tpu.memory_space<vmem>>, %arg3: memref<1x512xf32, #tpu.memory_space<vmem>>, %arg4: memref<512x256xbf16, #tpu.memory_space<vmem>>, %arg5: memref<1x256xf32, #tpu.memory_space<vmem>>, %arg6: memref<256x32xbf16, #tpu.memory_space<vmem>>, %arg7: memref<1x32xf32, #tpu.memory_space<vmem>>, %arg8: memref<16x32xf32, #tpu.memory_space<vmem>>) attributes {dimension_semantics = [#tpu.dimension_semantics<parallel>], iteration_bounds = array<i64: 1>, scalar_prefetch = 0 : i64, scratch_operands = 0 : i64, tpu.core_type = #tpu.core_type<tc>, window_params = [{transform_indices = @transform_0, window_bounds = array<i64: 16, 64>}, {pipeline_mode = #tpu.pipeline_mode<synchronous>, transform_indices = @transform_1, window_bounds = array<i64: 64, 512>}, {pipeline_mode = #tpu.pipeline_mode<synchronous>, transform_indices = @transform_2, window_bounds = array<i64: 1, 512>}, {pipeline_mode = #tpu.pipeline_mode<synchronous>, transform_indices = @transform_3, window_bounds = array<i64: 512, 256>}, {pipeline_mode = #tpu.pipeline_mode<synchronous>, transform_indices = @transform_4, window_bounds = array<i64: 1, 256>}, {pipeline_mode = #tpu.pipeline_mode<synchronous>, transform_indices = @transform_5, window_bounds = array<i64: 256, 32>}, {pipeline_mode = #tpu.pipeline_mode<synchronous>, transform_indices = @transform_6, window_bounds = array<i64: 1, 32>}, {transform_indices = @transform_7, window_bounds = array<i64: 16, 32>}]} {
    %c0 = arith.constant 0 : index
    %c0_0 = arith.constant 0 : index
    %0 = vector.load %arg1[%c0, %c0_0] : memref<16x64xbf16, #tpu.memory_space<vmem>>, vector<16x64xbf16>
    %c0_1 = arith.constant 0 : index
    %c0_2 = arith.constant 0 : index
    %1 = vector.load %arg2[%c0_1, %c0_2] : memref<64x512xbf16, #tpu.memory_space<vmem>>, vector<64x512xbf16>
    %cst = arith.constant dense<0.000000e+00> : vector<16x512xf32>
    %2 = tpu.matmul %0, %1, %cst {dimension_numbers = #tpu.dot_dimension_numbers<[1], [0], [0], [1], [0, 0, 1, 1], [], []>} : vector<16x64xbf16>, vector<64x512xbf16>, vector<16x512xf32> -> vector<16x512xf32>
    %c0_3 = arith.constant 0 : index
    %c0_4 = arith.constant 0 : index
    %3 = vector.load %arg3[%c0_3, %c0_4] : memref<1x512xf32, #tpu.memory_space<vmem>>, vector<1x512xf32>
    %4 = vector.broadcast %3 : vector<1x512xf32> to vector<16x512xf32>
    %5 = arith.addf %2, %4 : vector<16x512xf32>
    %6 = arith.truncf %5 : vector<16x512xf32> to vector<16x512xbf16>
    %cst_5 = arith.constant 0.000000e+00 : bf16
    %7 = vector.broadcast %cst_5 : bf16 to vector<16x512xbf16>
    %8 = arith.cmpf ogt, %6, %7 : vector<16x512xbf16>
    %cst_6 = arith.constant 2.001950e-01 : bf16
    %9 = vector.broadcast %cst_6 : bf16 to vector<16x512xbf16>
    %10 = arith.mulf %9, %6 : vector<16x512xbf16>
    %11 = arith.select %8, %6, %10 : vector<16x512xi1>, vector<16x512xbf16>
    %c0_7 = arith.constant 0 : index
    %c0_8 = arith.constant 0 : index
    %12 = vector.load %arg4[%c0_7, %c0_8] : memref<512x256xbf16, #tpu.memory_space<vmem>>, vector<512x256xbf16>
    %cst_9 = arith.constant dense<0.000000e+00> : vector<16x256xf32>
    %13 = tpu.matmul %11, %12, %cst_9 {dimension_numbers = #tpu.dot_dimension_numbers<[1], [0], [0], [1], [0, 0, 1, 1], [], []>} : vector<16x512xbf16>, vector<512x256xbf16>, vector<16x256xf32> -> vector<16x256xf32>
    %c0_10 = arith.constant 0 : index
    %c0_11 = arith.constant 0 : index
    %14 = vector.load %arg5[%c0_10, %c0_11] : memref<1x256xf32, #tpu.memory_space<vmem>>, vector<1x256xf32>
    %15 = vector.broadcast %14 : vector<1x256xf32> to vector<16x256xf32>
    %16 = arith.addf %13, %15 : vector<16x256xf32>
    %17 = arith.truncf %16 : vector<16x256xf32> to vector<16x256xbf16>
    %cst_12 = arith.constant 0.000000e+00 : bf16
    %18 = vector.broadcast %cst_12 : bf16 to vector<16x256xbf16>
    %19 = arith.cmpf ogt, %17, %18 : vector<16x256xbf16>
    %cst_13 = arith.constant 2.001950e-01 : bf16
    %20 = vector.broadcast %cst_13 : bf16 to vector<16x256xbf16>
    %21 = arith.mulf %20, %17 : vector<16x256xbf16>
    %22 = arith.select %19, %17, %21 : vector<16x256xi1>, vector<16x256xbf16>
    %c0_14 = arith.constant 0 : index
    %c0_15 = arith.constant 0 : index
    %23 = vector.load %arg6[%c0_14, %c0_15] : memref<256x32xbf16, #tpu.memory_space<vmem>>, vector<256x32xbf16>
    %cst_16 = arith.constant dense<0.000000e+00> : vector<16x32xf32>
    %24 = tpu.matmul %22, %23, %cst_16 {dimension_numbers = #tpu.dot_dimension_numbers<[1], [0], [0], [1], [0, 0, 1, 1], [], []>} : vector<16x256xbf16>, vector<256x32xbf16>, vector<16x32xf32> -> vector<16x32xf32>
    %c0_17 = arith.constant 0 : index
    %c0_18 = arith.constant 0 : index
    %25 = vector.load %arg7[%c0_17, %c0_18] : memref<1x32xf32, #tpu.memory_space<vmem>>, vector<1x32xf32>
    %26 = vector.broadcast %25 : vector<1x32xf32> to vector<16x32xf32>
    %27 = arith.addf %24, %26 : vector<16x32xf32>
    %c0_19 = arith.constant 0 : index
    %c0_20 = arith.constant 0 : index
    %28 = vector.load %arg8[%c0_19, %c0_20] : memref<16x32xf32, #tpu.memory_space<vmem>>, vector<16x32xf32>
    tpu.vector_store %arg8[%c0_19, %c0_20], %27 {strides = array<i32>} : memref<16x32xf32, #tpu.memory_space<vmem>>, vector<16x32xf32>,
    return
  }
  func.func @transform_0(%arg0: i32) -> (i32, i32) {
    %c0_i32 = arith.constant 0 : i32
    %c0_i32_0 = arith.constant 0 : i32
    return %arg0, %c0_i32 : i32, i32
  }
  func.func @transform_1(%arg0: i32) -> (i32, i32) {
    %c0_i32 = arith.constant 0 : i32
    %c0_i32_0 = arith.constant 0 : i32
    %c0_i32_1 = arith.constant 0 : i32
    return %c0_i32, %c0_i32_0 : i32, i32
  }
  func.func @transform_2(%arg0: i32) -> (i32, i32) {
    %c0_i32 = arith.constant 0 : i32
    %c0_i32_0 = arith.constant 0 : i32
    %c0_i32_1 = arith.constant 0 : i32
    return %c0_i32, %c0_i32_0 : i32, i32
  }
  func.func @transform_3(%arg0: i32) -> (i32, i32) {
    %c0_i32 = arith.constant 0 : i32
    %c0_i32_0 = arith.constant 0 : i32
    %c0_i32_1 = arith.constant 0 : i32
    return %c0_i32, %c0_i32_0 : i32, i32
  }
  func.func @transform_4(%arg0: i32) -> (i32, i32) {
    %c0_i32 = arith.constant 0 : i32
    %c0_i32_0 = arith.constant 0 : i32
    %c0_i32_1 = arith.constant 0 : i32
    return %c0_i32, %c0_i32_0 : i32, i32
  }
  func.func @transform_5(%arg0: i32) -> (i32, i32) {
    %c0_i32 = arith.constant 0 : i32
    %c0_i32_0 = arith.constant 0 : i32
    %c0_i32_1 = arith.constant 0 : i32
    return %c0_i32, %c0_i32_0 : i32, i32
  }
  func.func @transform_6(%arg0: i32) -> (i32, i32) {
    %c0_i32 = arith.constant 0 : i32
    %c0_i32_0 = arith.constant 0 : i32
    %c0_i32_1 = arith.constant 0 : i32
    return %c0_i32, %c0_i32_0 : i32, i32
  }
  func.func @transform_7(%arg0: i32) -> (i32, i32) {
    %c0_i32 = arith.constant 0 : i32
    %c0_i32_0 = arith.constant 0 : i32
    return %arg0, %c0_i32 : i32, i32
  }
}

</mosaic_0001>

<bundles_post_ra>
// kernel: tpu_custom_call.1
= control target key start
LH: loop header
LB: loop body
LE: loop exit
PB: predicated region body
PF: predicated region fallthrough
CT: control target
= control target key end

     0   :  { %12 = vsyncpa [#allocation3], 0  ;;  %s1479_s0 = inlined_call_operand.vmem [shape: bf16[16,64], index: 0, kind: input, shape index: {}]   ;;  %s1480_s1 = inlined_call_operand.vmem [shape: bf16[64,512], index: 1, kind: input, shape index: {}]   ;;  %s1481_s2 = inlined_call_operand.vmem [shape: f32[1,512], index: 2, kind: input, shape index: {}]   ;;  %s1482_s3 = inlined_call_operand.hbm [shape: bf16[512,256], index: 3, kind: input, shape index: {}]   ;;  %s1483_s4 = inlined_call_operand.vmem [shape: f32[1,256], index: 4, kind: input, shape index: {}]   ;;  %s1484_s5 = inlined_call_operand.vmem [shape: bf16[256,32], index: 5, kind: input, shape index: {}]   ;;  %s1485_s6 = inlined_call_operand.vmem [shape: f32[1,32], index: 6, kind: input, shape index: {}]   ;;  %s1486_s7 = inlined_call_operand.hbm [shape: f32[16,32], index: 7, kind: output, shape index: {}]  }
   0x1   :  { %13 = vsyncpa [#allocation4], 0  ;;  %s1280_s24 = smov [#allocation2]   ;;  %s1232_s28 = scalar_lea.hbm %s1482_s3, 8192 }
   0x2   :  { %s25_s25 = sshll.u32 %s1280_s24, 4  ;;  %p1233_p0 = scmp.ne.s32.totalorder %s1482_s3, %s1232_s28  ;;  %s26_s25 = int_to_ptr.vmem [resolvable:$true] %s25_s25 }
   0x3   :  { %p1236_p1 = scmp.lt.u32.totalorder %s1232_s28, %s1482_s3 }
   0x5   :  { %p1238_p2 = pnand %p1236_p1, %p1233_p0 }
   0x7   :  { %1241 = shalt.err (!%p1238_p2)
}
   0x8   :  { %s1242_s10 = scalar_lea.vmem %s26_s25, 8192  ;;  %p1247_p4 = scmp.lt.s32.totalorder %s26_s25, %s26_s25 }
   0x9   :  { %p1243_p3 = scmp.ne.s32.totalorder %s26_s25, %s1242_s10  ;;  %p1248_p5 = scmp.lt.s32.totalorder %s1242_s10, %s1242_s10 }
   0xb   :  { %p1249_p6 = por %p1248_p5, %p1247_p4 }
   0xd   :  { %p1250_p7 = pnand %p1249_p6, %p1243_p3 }
   0xf   :  { %1253 = shalt.err (!%p1250_p7)
}
  0x10   :  { %s1281_s11 = smov 128   ;;  %s1282_s12 = smov 8  }
  0x11   :  { %31 = dma.hbm_to_vmem [thread:$0]  %s1482_s3, 8192, %s26_s25, [#allocation3], %s1281_s11, %s1281_s11, %s1282_s12  }
  0x12   :  { %1276 = dma.done.wait [#allocation3], 8192  }
  0x13   :  { %1277 = vsyncadd [#allocation3], 4294959104  ;;  %v1283_v0 = vmov 0   ;;  %v1095_v1 = vld [vmem:[%s1480_s1 + $0x4] ss:$16 sps:$4 sm:$0xff]   ;;  %vm168_vm0 = vcmask 523264  }
  0x14   :  { %204 = vmatprep.mubr.bf16.mxu0 %v1283_v0  ;;  %v1097_v2 = vld [vmem:[%s1480_s1] ss:$16 sps:$4 sm:$0xff]   ;;  %172 = vmatprep.subr.bf16.mxu0 %v1095_v1  ;;  %v1098_v3 = vld [vmem:[%s1480_s1 + $0x24] ss:$16 sps:$4 sm:$0xff]   ;;  %v1110_v9 = vld [vmem:[%s1480_s1 + $0xc] ss:$16 sps:$4 sm:$0xff]  }
  0x15   :  { %173 = vmatpush1.bf16.msra.mxu0 %v1097_v2  ;;  %v1100_v4 = vld [vmem:[%s1480_s1 + $0x20] ss:$16 sps:$4 sm:$0xff]   ;;  %v1101_v5 = vld [vmem:[%s1480_s1 + $0x44] ss:$16 sps:$4 sm:$0xff]   ;;  %v1108_v14 = vld [vmem:[%s1480_s1 + $0x8] ss:$16 sps:$4 sm:$0xff]  }
  0x16   :  { %174 = vmatprep.subr.bf16.mxu0 %v1098_v3  ;;  %v1103_v6 = vld [vmem:[%s1480_s1 + $0x40] ss:$16 sps:$4 sm:$0xff]   ;;  %v1104_v7 = vld [vmem:[%s1480_s1 + $0x64] ss:$16 sps:$4 sm:$0xff]   ;;  %v1113_v15 = vld [vmem:[%s1480_s1 + $0x2c] ss:$16 sps:$4 sm:$0xff]  }
  0x17   :  { %v1106_v8 = vld [vmem:[%s1480_s1 + $0x60] ss:$16 sps:$4 sm:$0xff]   ;;  %v1120_v10 = vld [vmem:[#allocation2 + $0x4] ss:$8 sps:$4 sm:$0xff]   ;;  %v1123_v12 = vld [vmem:[#allocation2 + $0x14] ss:$8 sps:$4 sm:$0xff]  }
  0x18   :  { %v1122_v11 = vld [vmem:[#allocation2] ss:$8 sps:$4 sm:$0xff]   ;;  %670 = vmatprep.subr.bf16.mxu1 %v1120_v10  ;;  %v1125_v16 = vld [vmem:[#allocation2 + $0x10] ss:$8 sps:$4 sm:$0xff]   ;;  %v1126_v17 = vld [vmem:[#allocation2 + $0x24] ss:$8 sps:$4 sm:$0xff]  }
  0x19   :  { %175 = vmatpush1.bf16.msra.mxu0 %v1100_v4  ;;  %v1107_v13 = vld [vmem:[%s1479_s0] sm:$0xff]   ;;  %671 = vmatpush1.bf16.msra.mxu1 %v1122_v11  ;;  %v1111_v18 = vld [vmem:[%s1480_s1 + $0x28] ss:$16 sps:$4 sm:$0xff]   ;;  %v1116_v19 = vld [vmem:[%s1480_s1 + $0x4c] ss:$16 sps:$4 sm:$0xff]   ;;  %vm940_vm7 = vcmask 261120  }
  0x1a   :  { %176 = vmatprep.subr.bf16.mxu0 %v1101_v5  ;;  %672 = vmatprep.subr.bf16.mxu1 %v1123_v12  ;;  %v1128_v20 = vld [vmem:[#allocation2 + $0x20] ss:$8 sps:$4 sm:$0xff]   ;;  %v1129_v21 = vld [vmem:[#allocation2 + $0x34] ss:$8 sps:$4 sm:$0xff]   ;;  %v1131_v24 = vld [vmem:[#allocation2 + $0x30] ss:$8 sps:$4 sm:$0xff]  }
  0x1b   :  { %v1114_v22 = vld [vmem:[%s1480_s1 + $0x48] ss:$16 sps:$4 sm:$0xff]   ;;  %v1119_v23 = vld [vmem:[%s1480_s1 + $0x6c] ss:$16 sps:$4 sm:$0xff]   ;;  %s1284_s13 = smov [#allocation5]  }
  0x1c   :  { %v1132_v25 = vld [vmem:[#allocation2 + $0x44] ss:$8 sps:$4 sm:$0xff]   ;;  %v1117_v26 = vld [vmem:[%s1480_s1 + $0x68] ss:$16 sps:$4 sm:$0xff]   ;;  %v1138_v29 = vld [vmem:[#allocation2 + $0x54] ss:$8 sps:$4 sm:$0xff]  }
  0x1d   :  { %177 = vmatpush1.bf16.msra.mxu0 %v1103_v6  ;;  %673 = vmatpush1.bf16.msra.mxu1 %v1125_v16  ;;  %v1136_v27 = vld [vmem:[#allocation2 + $0x104] ss:$8 sps:$4 sm:$0xff]   ;;  %v1137_v28 = vld [vmem:[#allocation2 + $0x40] ss:$8 sps:$4 sm:$0xff]   ;;  %v1142_v31 = vld [vmem:[#allocation2 + $0x114] ss:$8 sps:$4 sm:$0xff]  }
  0x1e   :  { %178 = vmatprep.subr.bf16.mxu0 %v1104_v7  ;;  %674 = vmatprep.subr.bf16.mxu1 %v1126_v17  ;;  %v1134_v30 = vld [vmem:[#allocation2 + $0x100] ss:$8 sps:$4 sm:$0xff]   ;;  %v1143_v32 = vld [vmem:[#allocation2 + $0x50] ss:$8 sps:$4 sm:$0xff]   ;;  %v1144_v33 = vld [vmem:[#allocation2 + $0x64] ss:$8 sps:$4 sm:$0xff]  }
  0x1f   :  { %v1140_v34 = vld [vmem:[#allocation2 + $0x110] ss:$8 sps:$4 sm:$0xff]   ;;  %v1148_v35 = vld [vmem:[#allocation2 + $0x124] ss:$8 sps:$4 sm:$0xff]   ;;  %v1149_v36 = vld [vmem:[#allocation2 + $0x60] ss:$8 sps:$4 sm:$0xff]  }
  0x20   :  { %v1150_v37 = vld [vmem:[#allocation2 + $0x74] ss:$8 sps:$4 sm:$0xff]   ;;  %v1146_v38 = vld [vmem:[#allocation2 + $0x120] ss:$8 sps:$4 sm:$0xff]   ;;  %v1155_v40 = vld [vmem:[#allocation2 + $0x70] ss:$8 sps:$4 sm:$0xff]  }
  0x21   :  { %179 = vmatpush1.bf16.msra.mxu0 %v1106_v8  ;;  %675 = vmatpush1.bf16.msra.mxu1 %v1128_v20  ;;  %v1154_v39 = vld [vmem:[#allocation2 + $0x134] ss:$8 sps:$4 sm:$0xff]   ;;  %v1152_v41 = vld [vmem:[#allocation2 + $0x130] ss:$8 sps:$4 sm:$0xff]   ;;  %v1156_v42 = vld [vmem:[#allocation2 + $0x84] ss:$8 sps:$4 sm:$0xff]  }
  0x22   :  { %215 = vmatprep.subr.bf16.mxu0 %v1110_v9  ;;  %676 = vmatprep.subr.bf16.mxu1 %v1129_v21  ;;  %v1160_v43 = vld [vmem:[#allocation2 + $0x144] ss:$8 sps:$4 sm:$0xff]   ;;  %v1161_v44 = vld [vmem:[#allocation2 + $0x80] ss:$8 sps:$4 sm:$0xff]   ;;  %v1162_v45 = vld [vmem:[#allocation2 + $0x94] ss:$8 sps:$4 sm:$0xff]  }
  0x23   :  { %v1158_v46 = vld [vmem:[#allocation2 + $0x140] ss:$8 sps:$4 sm:$0xff]   ;;  %v1166_v47 = vld [vmem:[#allocation2 + $0x154] ss:$8 sps:$4 sm:$0xff]   ;;  %v1167_v48 = vld [vmem:[#allocation2 + $0x90] ss:$8 sps:$4 sm:$0xff]  }
  0x24   :  { %977 = vmatmul.mubr.msk.bf16.vlgmr.msra.gmra.mrb[0].mxu0 %vm168_vm0, %v1107_v13  ;;  %v1168_v49 = vld [vmem:[#allocation2 + $0xa4] ss:$8 sps:$4 sm:$0xff]   ;;  %v1164_v50 = vld [vmem:[#allocation2 + $0x150] ss:$8 sps:$4 sm:$0xff]   ;;  %v1173_v52 = vld [vmem:[#allocation2 + $0xa0] ss:$8 sps:$4 sm:$0xff]  }
  0x25   :  { %216 = vmatpush1.bf16.msra.mxu0 %v1108_v14  ;;  %247 = vmatprep.mubr.bf16.mxu0 %v1283_v0  ;;  %v1172_v51 = vld [vmem:[#allocation2 + $0x164] ss:$8 sps:$4 sm:$0xff]   ;;  %v1174_v53 = vld [vmem:[#allocation2 + $0xb4] ss:$8 sps:$4 sm:$0xff]   ;;  %v1170_v54 = vld [vmem:[#allocation2 + $0x160] ss:$8 sps:$4 sm:$0xff]  }
  0x26   :  { %217 = vmatprep.subr.bf16.mxu0 %v1113_v15  ;;  %677 = vmatpush1.bf16.msra.mxu1 %v1131_v24  ;;  %v1178_v55 = vld [vmem:[#allocation2 + $0x174] ss:$8 sps:$4 sm:$0xff]   ;;  %v1179_v56 = vld [vmem:[#allocation2 + $0xb0] ss:$8 sps:$4 sm:$0xff]   ;;  %v1180_v57 = vld [vmem:[#allocation2 + $0xc4] ss:$8 sps:$4 sm:$0xff]  }
  0x27   :  { %678 = vmatprep.subr.bf16.mxu1 %v1132_v25  ;;  %v1176_v58 = vld [vmem:[#allocation2 + $0x170] ss:$8 sps:$4 sm:$0xff]   ;;  %v1184_v59 = vld [vmem:[#allocation2 + $0x184] ss:$8 sps:$4 sm:$0xff]   ;;  %v1185_v60 = vld [vmem:[#allocation2 + $0xc0] ss:$8 sps:$4 sm:$0xff]  }
  0x28   :  { %v1182_v61 = vld [vmem:[#allocation2 + $0x180] ss:$8 sps:$4 sm:$0xff]   ;;  %v1186_v62 = vld [vmem:[#allocation2 + $0xd4] ss:$8 sps:$4 sm:$0xff]   ;;  %v1188_v0 = vld [vmem:[#allocation2 + $0x190] ss:$8 sps:$4 sm:$0xff]  }
  0x29   :  { %218 = vmatpush1.bf16.msra.mxu0 %v1111_v18  ;;  %v1190_v63 = vld [vmem:[#allocation2 + $0x194] ss:$8 sps:$4 sm:$0xff]   ;;  %v1191_v1 = vld [vmem:[#allocation2 + $0xd0] ss:$8 sps:$4 sm:$0xff]   ;;  %v1192_v2 = vld [vmem:[#allocation2 + $0xe4] ss:$8 sps:$4 sm:$0xff]  }
  0x2a   :  { %219 = vmatprep.subr.bf16.mxu0 %v1116_v19  ;;  %679 = vmatpush1.bf16.msra.mxu1 %v1137_v28  ;;  %v1196_v3 = vld [vmem:[#allocation2 + $0x1a4] ss:$8 sps:$4 sm:$0xff]   ;;  %v1194_v4 = vld [vmem:[#allocation2 + $0x1a0] ss:$8 sps:$4 sm:$0xff]   ;;  %v1198_v6 = vld [vmem:[#allocation2 + $0xf4] ss:$8 sps:$4 sm:$0xff]   ;;  %v63_v19 = vlaneseq }
  0x2b   :  { %680 = vmatprep.subr.bf16.mxu1 %v1138_v29  ;;  %v1197_v5 = vld [vmem:[#allocation2 + $0xe0] ss:$8 sps:$4 sm:$0xff]   ;;  %v1200_v7 = vld [vmem:[#allocation2 + $0x1b0] ss:$8 sps:$4 sm:$0xff]   ;;  %v1202_v8 = vld [vmem:[#allocation2 + $0x1b4] ss:$8 sps:$4 sm:$0xff]  }
  0x2c   :  { %v1203_v9 = vld [vmem:[#allocation2 + $0xf0] ss:$8 sps:$4 sm:$0xff]   ;;  %v1206_v10 = vld [vmem:[#allocation2 + $0x1c4] ss:$8 sps:$4 sm:$0xff]   ;;  %v1204_v11 = vld [vmem:[#allocation2 + $0x1c0] ss:$8 sps:$4 sm:$0xff]  }
  0x2d   :  { %220 = vmatpush1.bf16.msra.mxu0 %v1114_v22  ;;  %v1209_v12 = vld [vmem:[#allocation2 + $0x1d4] ss:$8 sps:$4 sm:$0xff]   ;;  %v1212_v14 = vld [vmem:[#allocation2 + $0x1e4] ss:$8 sps:$4 sm:$0xff]   ;;  %v1210_v15 = vld [vmem:[#allocation2 + $0x1e0] ss:$8 sps:$4 sm:$0xff]  }
  0x2e   :  { %221 = vmatprep.subr.bf16.mxu0 %v1119_v23  ;;  %681 = vmatpush1.bf16.msra.mxu1 %v1143_v32  ;;  %v1215_v16 = vld [vmem:[#allocation2 + $0x1f4] ss:$8 sps:$4 sm:$0xff]   ;;  %v1213_v17 = vld [vmem:[#allocation2 + $0x1f0] ss:$8 sps:$4 sm:$0xff]   ;;  %v1216_v18 = vld [vmem:[%s1484_s5 + $0x40] sm:$0xff]   ;;  %v1396_v20 = vshrl.u32 %v63_v19, 7 }
  0x2f   :  { %682 = vmatprep.subr.bf16.mxu1 %v1144_v33  ;;  %v61_v22 = vld [vmem:[%s1481_s2] sm:$0xf]  ;;  %s948_s14 = sshll.u32 %s1284_s13, 4  ;;  %s949_s14 = int_to_ptr.vmem [resolvable:$true] %s948_s14 }
  0x30   :  { %v65_v21 = vsub.s32 0, %v1396_v20  ;;  %v69_v23 = vsub.s32 1, %v1396_v20  ;;  %s1254_s15 = scalar_lea.vmem %s949_s14, 256  ;;  %p1259_p9 = scmp.lt.s32.totalorder %s949_s14, %s949_s14 }
  0x31   :  { %222 = vmatpush1.bf16.msra.mxu0 %v1117_v26  ;;  %p1255_p8 = scmp.ne.s32.totalorder %s949_s14, %s1254_s15  ;;  %p1260_p10 = scmp.lt.s32.totalorder %s1254_s15, %s1254_s15 }
  0x32   :  { %713 = vmatprep.subr.bf16.mxu0 %v1136_v27  ;;  %683 = vmatpush1.bf16.msra.mxu1 %v1149_v36  ;;  %v66_v24 = vrot.slane %v61_v22, %v65_v21  ;;  %v70_v26 = vrot.slane %v61_v22, %v69_v23 }
  0x33   :  { %684 = vmatprep.subr.bf16.mxu1 %v1150_v37  ;;  %p1261_p11 = por %p1260_p10, %p1259_p9 }
  0x34   :  { %978 = vmatmul.mubr.msk.bf16.vlgmr.msra.gmra.mrb[4].mxu0 %vm168_vm0, %v1107_v13  ;;  %v1207_v13 = vld [vmem:[#allocation2 + $0x1d0] ss:$8 sps:$4 sm:$0xff]  }
  0x35   :  { %714 = vmatpush1.bf16.msra.mxu0 %v1134_v30  ;;  %p1262_p12 = pnand %p1261_p11, %p1255_p8 }
  0x36   :  { %715 = vmatprep.subr.bf16.mxu0 %v1142_v31  ;;  %685 = vmatpush1.bf16.msra.mxu1 %v1155_v40 }
  0x37   :  { %686 = vmatprep.subr.bf16.mxu1 %v1156_v42  ;;  %v77_v42 = vsub.s32 3, %v1396_v20 }
  0x39   :  { %716 = vmatpush1.bf16.msra.mxu0 %v1140_v34 }
  0x3a   :  { %717 = vmatprep.subr.bf16.mxu0 %v1148_v35  ;;  %687 = vmatpush1.bf16.msra.mxu1 %v1161_v44 }
  0x3b   :  { %688 = vmatprep.subr.bf16.mxu1 %v1162_v45  ;;  %v78_v45 = vrot.slane %v61_v22, %v77_v42 }
  0x3d   :  { %718 = vmatpush1.bf16.msra.mxu0 %v1146_v38  ;;  %v1217_v38 = vld [vmem:[%s1484_s5] sm:$0xff]  }
  0x3e   :  { %719 = vmatprep.subr.bf16.mxu0 %v1154_v39  ;;  %689 = vmatpush1.bf16.msra.mxu1 %v1167_v48 }
  0x3f   :  { %690 = vmatprep.subr.bf16.mxu1 %v1168_v49 }
  0x41   :  { %720 = vmatpush1.bf16.msra.mxu0 %v1152_v41  ;;  %v73_v41 = vsub.s32 2, %v1396_v20 }
  0x42   :  { %721 = vmatprep.subr.bf16.mxu0 %v1160_v43  ;;  %691 = vmatpush1.bf16.msra.mxu1 %v1173_v52 }
  0x43   :  { %692 = vmatprep.subr.bf16.mxu1 %v1174_v53  ;;  %v74_v43 = vrot.slane %v61_v22, %v73_v41 }
  0x45   :  { %722 = vmatpush1.bf16.msra.mxu0 %v1158_v46 }
  0x46   :  { %723 = vmatprep.subr.bf16.mxu0 %v1166_v47  ;;  %693 = vmatpush1.bf16.msra.mxu1 %v1179_v56 }
  0x47   :  { %694 = vmatprep.subr.bf16.mxu1 %v1180_v57 }
  0x49   :  { %724 = vmatpush1.bf16.msra.mxu0 %v1164_v50 }
  0x4a   :  { %725 = vmatprep.subr.bf16.mxu0 %v1172_v51  ;;  %695 = vmatpush1.bf16.msra.mxu1 %v1185_v60  ;;  %v1219_v60 = vld [vmem:[%s1484_s5 + $0x8] sm:$0xff]  }
  0x4b   :  { %696 = vmatprep.subr.bf16.mxu1 %v1186_v62  ;;  %v1221_v62 = vld [vmem:[%s1484_s5 + $0x10] sm:$0xff]  }
  0x4d   :  { %726 = vmatpush1.bf16.msra.mxu0 %v1170_v54 }
  0x4e   :  { %727 = vmatprep.subr.bf16.mxu0 %v1178_v55  ;;  %697 = vmatpush1.bf16.msra.mxu1 %v1191_v1  ;;  %v1224_v1 = vld [vmem:[%s1484_s5 + $0x60] sm:$0xff]  }
  0x4f   :  { %698 = vmatprep.subr.bf16.mxu1 %v1192_v2  ;;  %v1225_v2 = vld [vmem:[%s1484_s5 + $0x20] sm:$0xff]  }
  0x51   :  { %728 = vmatpush1.bf16.msra.mxu0 %v1176_v58 }
  0x52   :  { %729 = vmatprep.subr.bf16.mxu0 %v1184_v59  ;;  %699 = vmatpush1.bf16.msra.mxu1 %v1197_v5  ;;  %v1218_v59 = vld [vmem:[%s1484_s5 + $0x48] sm:$0xff]   ;;  %v1228_v5 = vld [vmem:[%s1484_s5 + $0x70] sm:$0xff]  }
  0x53   :  { %700 = vmatprep.subr.bf16.mxu1 %v1198_v6  ;;  %v1229_v6 = vld [vmem:[%s1484_s5 + $0x30] sm:$0xff]  }
  0x55   :  { %730 = vmatpush1.bf16.msra.mxu0 %v1182_v61  ;;  %v1220_v61 = vld [vmem:[%s1484_s5 + $0x50] sm:$0xff]  }
  0x56   :  { %731 = vmatprep.subr.bf16.mxu0 %v1190_v63  ;;  %701 = vmatpush1.bf16.msra.mxu1 %v1203_v9  ;;  %v1222_v63 = vld [vmem:[%s1484_s5 + $0x58] sm:$0xff]  }
  0x57   :  { %1060 = vmatprep.subr.bf16.mxu1 %v1216_v18 }
  0x59   :  { %732 = vmatpush1.bf16.msra.mxu0 %v1188_v0  ;;  %v1223_v0 = vld [vmem:[%s1484_s5 + $0x18] sm:$0xff]  }
  0x5a   :  { %733 = vmatprep.subr.bf16.mxu0 %v1196_v3  ;;  %v1226_v3 = vld [vmem:[%s1484_s5 + $0x68] sm:$0xff]  }
  0x5d   :  { %734 = vmatpush1.bf16.msra.mxu0 %v1194_v4  ;;  %v1227_v4 = vld [vmem:[%s1484_s5 + $0x28] sm:$0xff]  }
  0x5e   :  { %735 = vmatprep.subr.bf16.mxu0 %v1202_v8  ;;  %v1231_v8 = vld [vmem:[%s1484_s5 + $0x38] sm:$0xff]  }
  0x61   :  { %736 = vmatpush1.bf16.msra.mxu0 %v1200_v7  ;;  %v1230_v7 = vld [vmem:[%s1484_s5 + $0x78] sm:$0xff]  }
  0x62   :  { %737 = vmatprep.subr.bf16.mxu0 %v1206_v10 }
  0x65   :  { %738 = vmatpush1.bf16.msra.mxu0 %v1204_v11 }
  0x66   :  { %739 = vmatprep.subr.bf16.mxu0 %v1209_v12 }
  0x69   :  { %740 = vmatpush1.bf16.msra.mxu0 %v1207_v13  ;;  %v338_v13 = vld [vmem:[%s1483_s4] sm:$0x3] }
  0x6a   :  { %741 = vmatprep.subr.bf16.mxu0 %v1212_v14  ;;  %v343_v14 = vrot.slane %v338_v13, %v65_v21 }
  0x6d   :  { %742 = vmatpush1.bf16.msra.mxu0 %v1210_v15  ;;  %v347_v15 = vrot.slane %v338_v13, %v69_v23 }
  0x6e   :  { %743 = vmatprep.subr.bf16.mxu0 %v1215_v16 }
  0x71   :  { %744 = vmatpush1.bf16.msra.mxu0 %v1213_v17 }
  0xf7   :  { %v206_v25 = vpop.f32.mrb[0].mxu0 }
  0xf8   :  { %v207_v27 = vadd.f32 %v206_v25, %v66_v24  ;;  %v208_v28 = vpop.f32.mrb[1].mxu0 }
  0xf9   :  { %v210_v29 = vpop.f32.mrb[2].mxu0  ;;  %v209_v32 = vadd.f32 %v208_v28, %v70_v26 }
  0xfa   :  { %v211_v30 = vadd.f32 %v210_v29, %v66_v24  ;;  %v212_v31 = vpop.f32.mrb[3].mxu0 }
  0xfb   :  { %v213_v33 = vadd.f32 %v212_v31, %v70_v26 }
  0xfc   :  { %v258_v34 = vpack.c.bf16 %v211_v30, %v207_v27 }
  0xfd   :  { %v259_v35 = vpack.c.bf16 %v213_v33, %v209_v32 }
  0xfe   :  { %v266_v36 = vmul.bf16 1045249613, %v258_v34  ;;  %vm262_vm2 = vcmp.gt.bf16.partialorder %v258_v34, 0 }
  0xff   :  { %vm263_vm1 = vcmp.gt.bf16.partialorder %v259_v35, 0  ;;  %v267_v37 = vmul.bf16 1045249613, %v259_v35 }
 0x100   :  { %v270_v40 = vsel %vm262_vm2, %v258_v34, %v266_v36 }
 0x101   :  { %v271_v39 = vsel %vm263_vm1, %v259_v35, %v267_v37  ;;  %v1043_v35 = vld [vmem:[%s1485_s6] ss:$0 sm:$0xff] }
 0x102   :  { %702 = vmatprep.mubr.bf16.mxu1 %v271_v39 }
 0x103   :  { %703 = vmatmul.mubr.bf16.vlgmr.msra.gmra.mrb[0].mxu1 %v270_v40 }
 0x104   :  { %1061 = vmatpush3.bf16.msra.mxu1 %v1217_v38 }
 0x105   :  { %1062 = vmatprep.subr.bf16.mxu1 %v1218_v59 }
 0x107   :  { %v249_v44 = vpop.f32.mrb[4].mxu0 }
 0x108   :  { %v251_v46 = vpop.f32.mrb[5].mxu0  ;;  %v250_v48 = vadd.f32 %v249_v44, %v74_v43  ;;  %1063 = vmatpush3.bf16.msra.mxu1 %v1219_v60 }
 0x109   :  { %v253_v47 = vpop.f32.mrb[6].mxu0  ;;  %v252_v51 = vadd.f32 %v251_v46, %v78_v45  ;;  %1064 = vmatprep.subr.bf16.mxu1 %v1220_v61 }
 0x10a   :  { %v254_v49 = vadd.f32 %v253_v47, %v74_v43  ;;  %v255_v50 = vpop.f32.mrb[7].mxu0 }
 0x10b   :  { %v256_v52 = vadd.f32 %v255_v50, %v78_v45 }
 0x10c   :  { %v260_v53 = vpack.c.bf16 %v254_v49, %v250_v48  ;;  %1065 = vmatpush3.bf16.msra.mxu1 %v1221_v62 }
 0x10d   :  { %v261_v54 = vpack.c.bf16 %v256_v52, %v252_v51  ;;  %1066 = vmatprep.subr.bf16.mxu1 %v1222_v63 }
 0x10e   :  { %v268_v55 = vmul.bf16 1045249613, %v260_v53  ;;  %vm264_vm4 = vcmp.gt.bf16.partialorder %v260_v53, 0 }
 0x10f   :  { %vm265_vm3 = vcmp.gt.bf16.partialorder %v261_v54, 0  ;;  %v269_v56 = vmul.bf16 1045249613, %v261_v54 }
 0x110   :  { %v272_v58 = vsel %vm264_vm4, %v260_v53, %v268_v55  ;;  %1067 = vmatpush3.bf16.msra.mxu1 %v1223_v0 }
 0x111   :  { %v273_v57 = vsel %vm265_vm3, %v261_v54, %v269_v56  ;;  %1068 = vmatprep.subr.bf16.mxu1 %v1224_v1 }
 0x112   :  { %745 = vmatprep.mubr.bf16.mxu0 %v273_v57 }
 0x113   :  { %746 = vmatmul.mubr.bf16.vlgmr.msra.gmra.mrb[8].mxu0 %v272_v58 }
 0x114   :  { %1069 = vmatpush3.bf16.msra.mxu1 %v1225_v2 }
 0x115   :  { %1070 = vmatprep.subr.bf16.mxu1 %v1226_v3 }
 0x118   :  { %1071 = vmatpush3.bf16.msra.mxu1 %v1227_v4 }
 0x119   :  { %1072 = vmatprep.subr.bf16.mxu1 %v1228_v5 }
 0x11c   :  { %1073 = vmatpush3.bf16.msra.mxu1 %v1229_v6 }
 0x11d   :  { %1074 = vmatprep.subr.bf16.mxu1 %v1230_v7 }
 0x120   :  { %1075 = vmatpush3.bf16.msra.mxu1 %v1231_v8 }
 0x1d6   :  { %v704_v9 = vpop.f32.mrb[0].mxu1 }
 0x1d7   :  { %v706_v10 = vpop.f32.mrb[1].mxu1  ;;  %v705_v16 = vadd.f32 %v704_v9, %v343_v14 }
 0x1d8   :  { %v708_v11 = vpop.f32.mrb[2].mxu1  ;;  %v707_v17 = vadd.f32 %v706_v10, %v347_v15 }
 0x1d9   :  { %v710_v12 = vpop.f32.mrb[3].mxu1  ;;  %v709_v19 = vadd.f32 %v708_v11, %v343_v14 }
 0x1da   :  { %v711_v25 = vadd.f32 %v710_v12, %v347_v15 }
 0x1e6   :  { %v747_v18 = vpop.f32.mrb[8].mxu0 }
 0x1e7   :  { %v748_v22 = vadd.f32 %v747_v18, %v705_v16  ;;  %v749_v24 = vpop.f32.mrb[9].mxu0 }
 0x1e8   :  { %v750_v26 = vadd.f32 %v749_v24, %v707_v17  ;;  %v751_v27 = vpop.f32.mrb[10].mxu0 }
 0x1e9   :  { %v752_v28 = vadd.f32 %v751_v27, %v709_v19  ;;  %v753_v29 = vpop.f32.mrb[11].mxu0 }
 0x1ea   :  { %v754_v30 = vadd.f32 %v753_v29, %v711_v25 }
 0x1eb   :  { %v756_v31 = vpack.c.bf16 %v752_v28, %v748_v22 }
 0x1ec   :  { %v757_v32 = vpack.c.bf16 %v754_v30, %v750_v26 }
 0x1ed   :  { %v760_v33 = vmul.bf16 1045249613, %v756_v31  ;;  %vm758_vm6 = vcmp.gt.bf16.partialorder %v756_v31, 0 }
 0x1ee   :  { %vm759_vm5 = vcmp.gt.bf16.partialorder %v757_v32, 0  ;;  %v761_v21 = vmul.bf16 1045249613, %v757_v32 }
 0x1ef   :  { %v762_v23 = vsel %vm758_vm6, %v756_v31, %v760_v33 }
 0x1f0   :  { %v763_v20 = vsel %vm759_vm5, %v757_v32, %v761_v21 }
 0x1f1   :  { %931 = vmatprep.mubr.bf16.mxu1 %v763_v20 }
 0x1f2   :  { %932 = vmatmul.mubr.bf16.vlgmr.msra.gmra.mrb[4].mxu1 %v762_v23 }
 0x2c5   :  { %v1076_v34 = vpop.f32.mrb[4].mxu1 }
 0x2c6   :  { %v1077_v36 = vpop.f32.mrb[5].mxu1 }
 0x2c7   :  { %v1078_v37 = vadd.f32 %v1077_v36, %v1076_v34  ;;  %v1079_v38 = vpop.f32.mrb[6].mxu1 }
 0x2c8   :  { %v1080_v39 = vpop.f32.mrb[7].mxu1 }
 0x2c9   :  { %v934_v40 = vadd.f32 %v1078_v37, %v1043_v35  ;;  %v1081_v41 = vadd.f32 %v1080_v39, %v1079_v38 }
 0x2cb   :  { %v937_v42 = vadd.f32 %v1081_v41, %v1043_v35  ;;  %941 = vst.msk [vmem:[#allocation5] sm:$0xff] %vm940_vm7, %v934_v40 }
 0x2cd   :  { %942 = vst.msk [vmem:[#allocation5 + $0x8] sm:$0xff] %vm940_vm7, %v937_v42 }
 0x2ce   :  { %1265 = shalt.err (!%p1262_p12)
}
 0x2cf   :  { %s1266_s0 = scalar_lea.hbm %s1486_s7, 256 }
 0x2d0   :  { %p1267_p13 = scmp.ne.s32.totalorder %s1486_s7, %s1266_s0  ;;  %p1270_p0 = scmp.lt.u32.totalorder %s1266_s0, %s1486_s7 }
 0x2d2   :  { %p1272_p1 = pnand %p1270_p0, %p1267_p13 }
 0x2d4   :  { %1275 = shalt.err (!%p1272_p1)
}
 0x2d5   :  { %954 = dma.vmem_to_hbm [thread:$0]  %s949_s14, 256, %s1486_s7, [#allocation4], %s1281_s11, %s1281_s11, %s1282_s12  }
 0x2d6   :  { %1278 = dma.done.wait [#allocation4], 256  }
 0x2d7   :  { %1279 = vsyncadd [#allocation4], 4294967040 }
 0x2d8   :  { %958 = vsyncpa [#allocation3], 1 }
 0x2d9   :  { %959 = vsyncpa [#allocation4], 1 }

</bundles_post_ra>
